<compile_context>
chip_gen: v7x
topology: tpu7x:2x2x1
jax: 0.10.0
libtpu: 0.0.40
codegen_flags: <defaults>
</compile_context>

<pallas_src>
import functools
import math

import jax
import jax.numpy as jnp
from jax import lax
from jax.experimental import pallas as pl
from jax.experimental.pallas import tpu as pltpu


# ------------------------------ fused kernel ----------------------------------

def _generator_kernel(x_ref,
                      w0_ref, b0_ref,        # fused first layers: [reg_mlp.0 | cls_FFN.w_1]
                      wr2_ref, br2_ref,      # reg_mlp.2
                      wr3_ref, br3_ref,      # reg_mlp.4 with pairwise-cumsum folded in
                      wcls_ref, bcls_ref,    # folded wf2∘wc1∘wc2 affine chain
                      pred_ref, conf_ref,
                      *, n_props, reg_width):
    """Forward for one (block_rows, d_model) row slab (rows = flattened B*N)."""
    rows = x_ref.shape[0]
    n_groups = rows // n_props            # whole scenes per tile (asserted in wrapper)

    x = x_ref[...]                        # (rows, D) bf16 — the streamed operand

    # -------- fused first layer (both branches are ReLU-activated) ------------
    h0 = jnp.dot(x, w0_ref[...], preferred_element_type=jnp.float32) + b0_ref[...]
    h0 = jnp.maximum(h0, 0.0)             # (rows, 2*reg_h + 2*D) f32
    h_reg = h0[:, :reg_width]             # (rows, 2*reg_h)  — lane-aligned static slice
    h_cls = h0[:, reg_width:]             # (rows, 2*D)

    # -------- regression head: Lin+ReLU, Lin (cumsum folded into wr3) ---------
    h1 = jnp.dot(h_reg.astype(jnp.bfloat16), wr2_ref[...],
                 preferred_element_type=jnp.float32) + br2_ref[...]
    h1 = jnp.maximum(h1, 0.0)             # (rows, reg_h)
    pred = jnp.dot(h1.astype(jnp.bfloat16), wr3_ref[...],
                   preferred_element_type=jnp.float32) + br3_ref[...]
    pred_ref[...] = pred.astype(pred_ref.dtype)

    # -------- classification head: folded affine chain -> per-scene softmax ---
    # logit_i = <h_cls[i, :], wcls> + bcls   (VPU multiply + lane reduce, f32)
    logit = jnp.sum(h_cls * wcls_ref[...], axis=-1, keepdims=True) + bcls_ref[...]

    # Segmented softmax over the n_props contiguous rows of each scene group,
    # stabilized with the per-group max. Membership mask built from iota — no
    # HBM-resident grouping matrix, no MXU op.
    row_idx = lax.broadcasted_iota(jnp.int32, (rows, n_groups), 0)
    grp_start = lax.broadcasted_iota(jnp.int32, (rows, n_groups), 1) * n_props
    member = (row_idx >= grp_start) & (row_idx < grp_start + n_props)
    memf = member.astype(jnp.float32)                     # (rows, n_groups) 0/1

    grp_max = jnp.max(jnp.where(member, logit, -jnp.inf), axis=0, keepdims=True)
    row_max = jnp.sum(memf * grp_max, axis=1, keepdims=True)      # broadcast back
    e = jnp.exp(logit - row_max)                                  # (rows, 1), >= exp(0) in-group
    grp_sum = jnp.sum(memf * e, axis=0, keepdims=True)            # (1, n_groups)
    denom = jnp.sum(memf * grp_sum, axis=1, keepdims=True)        # (rows, 1), >= 1
    conf_ref[...] = (e * pl.reciprocal(denom, approx=True)).astype(conf_ref.dtype)


# ------------------------------ row-tile selection -----------------------------

def _choose_block_rows(total_rows, n_props, target=512):
    """Largest row tile that (a) divides total_rows, (b) keeps whole scenes
    (multiple of n_props), (c) is sublane-tileable (multiple of 8), and
    (d) is <= target so there are >=2 grid steps to pipeline / shard across
    TensorCores. Falls back to a single full-slab step for tiny inputs."""
    base = (8 * n_props) // math.gcd(8, n_props)
    best = None
    d = base
    while d < total_rows and d <= target:
        if total_rows % d == 0:
            best = d
        d += base
    return best if best is not None else total_rows


# --------------------------------- wrapper -------------------------------------

def generator_forward(x, params):
    """x: (B, N, d_model) -> (pred: (B, N, out_size//2, 2), conf: (B, N))."""
    B, N, D = x.shape
    R = B * N
    out_size = params["wr3"].shape[1]
    reg_width = params["wr1"].shape[1]        # 2 * reg_h_dim
    d_ff = params["wf1"].shape[1]             # 2 * d_model

    # ---- offline (wrapper-side) weight folding, all composed in f32 ----------
    # pairwise cumsum:  pred.view(..., -1, 2).cumsum(-2)  ==  raw @ Mcum
    j = jnp.arange(out_size)
    mcum = (((j[:, None] % 2) == (j[None, :] % 2))
            & (j[:, None] <= j[None, :])).astype(jnp.float32)
    wr3_f = params["wr3"] @ mcum                                   # (reg_h, out)
    br3_f = params["br3"] @ mcum                                   # (1, out)

    # fuse the two first layers that both consume x (both followed by ReLU)
    w0 = jnp.concatenate([params["wr1"], params["wf1"]], axis=1)   # (D, 2*reg_h + 2*D)
    b0 = jnp.concatenate([params["br1"], params["bf1"]], axis=1)

    # inference-time fold of the activation-free chain wf2 -> wc1 -> wc2
    wcls = params["wf2"] @ params["wc1"] @ params["wc2"]           # (2*D, 1)
    bcls = (params["bf2"] @ params["wc1"] @ params["wc2"]
            + params["bc1"] @ params["wc2"] + params["bc2"])       # (1, 1)

    # ---- stream x in bf16, flattened (B, N) -> rows ---------------------------
    x2 = x.reshape(R, D).astype(jnp.bfloat16)

    block_rows = _choose_block_rows(R, N)
    assert R % block_rows == 0 and block_rows % N == 0, (
        "row tile must hold whole scenes (softmax groups may not straddle tiles)")
    grid = (R // block_rows,)

    weight_ops = (w0.astype(jnp.bfloat16), b0,
                  params["wr2"].astype(jnp.bfloat16), params["br2"],
                  wr3_f.astype(jnp.bfloat16), br3_f,
                  wcls.reshape(1, d_ff), bcls.reshape(1, 1))

    in_specs = (
        [pl.BlockSpec((block_rows, D), lambda i: (i, 0))]                  # x row slab
        + [pl.BlockSpec(w.shape, lambda i: (0, 0)) for w in weight_ops])   # resident weights
    out_specs = (pl.BlockSpec((block_rows, out_size), lambda i: (i, 0)),
                 pl.BlockSpec((block_rows, 1), lambda i: (i, 0)))

    kernel = functools.partial(_generator_kernel, n_props=N, reg_width=reg_width)

    pred_flat, conf_col = pl.pallas_call(
        kernel,
        out_shape=(jax.ShapeDtypeStruct((R, out_size), jnp.float32),
                   jax.ShapeDtypeStruct((R, 1), jnp.float32)),
        grid=grid,
        in_specs=in_specs,
        out_specs=out_specs,
        compiler_params=pltpu.CompilerParams(
            dimension_semantics=("parallel",),            # shard row tiles across TCs
            vmem_limit_bytes=48 * 1024 * 1024),           # fits v7x's 64 MiB; raise on v5e/v6e
    )(x2, *weight_ops)

    pred = pred_flat.reshape(B, N, out_size // 2, 2)      # pure layout, outside kernel
    conf = conf_col.reshape(B, N)
    return pred, conf


# ------------------------------ parameter init ---------------------------------

def init_generator_params(key, d_model, out_size, reg_h_dim=128):
    """Checkpoint-style params: weights (in, out) f32 (transpose of
    nn.Linear.weight), biases (1, out) f32. The wrapper does all folding,
    packing and bf16 casting."""
    def lin(kw, kb, din, dout):
        w = jax.random.normal(kw, (din, dout), jnp.float32) * (1.0 / jnp.sqrt(din))
        b = jax.random.normal(kb, (1, dout), jnp.float32) * 0.1
        return w, b

    ks = jax.random.split(key, 14)
    wr1, br1 = lin(ks[0], ks[1], d_model, 2 * reg_h_dim)
    wr2, br2 = lin(ks[2], ks[3], 2 * reg_h_dim, reg_h_dim)
    wr3, br3 = lin(ks[4], ks[5], reg_h_dim, out_size)
    wf1, bf1 = lin(ks[6], ks[7], d_model, 2 * d_model)        # cls_FFN, d_ff = 2*d_model
    wf2, bf2 = lin(ks[8], ks[9], 2 * d_model, d_model)
    wc1, bc1 = lin(ks[10], ks[11], d_model, d_model // 2)     # classification_layer
    wc2, bc2 = lin(ks[12], ks[13], d_model // 2, 1)
    return dict(wr1=wr1, br1=br1, wr2=wr2, br2=br2, wr3=wr3, br3=br3,
                wf1=wf1, bf1=bf1, wf2=wf2, bf2=bf2,
                wc1=wc1, bc1=bc1, wc2=wc2, bc2=bc2)


# ------------------------------ pure-JAX reference ------------------------------

def reference_forward(x, params):
    """Mirrors the PyTorch module exactly (f32 everywhere, dropout = identity)."""
    r = jax.nn.relu(x @ params["wr1"] + params["br1"])
    r = jax.nn.relu(r @ params["wr2"] + params["br2"])
    r = r @ params["wr3"] + params["br3"]
    B, N, O = r.shape
    pred = jnp.cumsum(r.reshape(B, N, O // 2, 2), axis=-2)
    c = jax.nn.relu(x @ params["wf1"] + params["bf1"])
    c = c @ params["wf2"] + params["bf2"]
    c = c @ params["wc1"] + params["bc1"]
    s = (c @ params["wc2"] + params["bc2"])[..., 0]
    conf = jax.nn.softmax(s, axis=-1)
    return pred, conf


# ----------------------------------- main ---------------------------------------

if __name__ == "__main__":
    # 8 scenes, 6 region proposals (module default), d_model=128 (lane-dense),
    # out_size=24 -> 12 cumulative (x, y) trajectory points per proposal.
    # R = 48 rows -> block_rows = 24, grid = (2,) so the pipeline/megacore path
    # is exercised even at demo size.
    B, N, D, OUT, REG_H = 8, 6, 128, 24, 128

    key = jax.random.PRNGKey(0)
    kx, kp = jax.random.split(key)
    x = jax.random.normal(kx, (B, N, D), jnp.float32)
    params = init_generator_params(kp, D, OUT, reg_h_dim=REG_H)

    pred, conf = jax.block_until_ready(generator_forward(x, params))

    assert pred.shape == (B, N, OUT // 2, 2)
    assert conf.shape == (B, N)
    assert bool(jnp.all(jnp.isfinite(pred)))
    assert bool(jnp.all(jnp.isfinite(conf)))
    assert bool(jnp.all(conf >= 0.0))
    # per-scene confidences sum to ~1 (approx reciprocal -> ~1e-3 rel error)
    assert bool(jnp.all(jnp.abs(conf.sum(axis=-1) - 1.0) < 1e-2))

    # compare against the pure-f32 reference (kernel uses bf16 MXU operands)
    pred_ref, conf_ref = reference_forward(x, params)
    pred_err = jnp.max(jnp.abs(pred - pred_ref) / (jnp.abs(pred_ref) + 1.0))
    conf_err = jnp.max(jnp.abs(conf - conf_ref))
    assert bool(pred_err < 8e-2), f"pred mismatch: {pred_err}"
    assert bool(conf_err < 8e-2), f"conf mismatch: {conf_err}"

    print("KERNEL_OK")
</pallas_src>

<mosaic_0001>
module attributes {stable_mosaic.version = 11 : i64} {
  func.func @_generator_kernel(%arg0: i32, %arg1: memref<24x128xbf16, #tpu.memory_space<vmem>>, %arg2: memref<128x512xbf16, #tpu.memory_space<vmem>>, %arg3: memref<1x512xf32, #tpu.memory_space<vmem>>, %arg4: memref<256x128xbf16, #tpu.memory_space<vmem>>, %arg5: memref<1x128xf32, #tpu.memory_space<vmem>>, %arg6: memref<128x24xbf16, #tpu.memory_space<vmem>>, %arg7: memref<1x24xf32, #tpu.memory_space<vmem>>, %arg8: memref<1x256xf32, #tpu.memory_space<vmem>>, %arg9: memref<1x1xf32, #tpu.memory_space<vmem>>, %arg10: memref<24x24xf32, #tpu.memory_space<vmem>>, %arg11: memref<24x1xf32, #tpu.memory_space<vmem>>) attributes {dimension_semantics = [#tpu.dimension_semantics<parallel>], iteration_bounds = array<i64: 2>, scalar_prefetch = 0 : i64, scratch_operands = 0 : i64, tpu.core_type = #tpu.core_type<tc>, window_params = [{transform_indices = @transform_0, window_bounds = array<i64: 24, 128>}, {pipeline_mode = #tpu.pipeline_mode<synchronous>, transform_indices = @transform_1, window_bounds = array<i64: 128, 512>}, {pipeline_mode = #tpu.pipeline_mode<synchronous>, transform_indices = @transform_2, window_bounds = array<i64: 1, 512>}, {pipeline_mode = #tpu.pipeline_mode<synchronous>, transform_indices = @transform_3, window_bounds = array<i64: 256, 128>}, {pipeline_mode = #tpu.pipeline_mode<synchronous>, transform_indices = @transform_4, window_bounds = array<i64: 1, 128>}, {pipeline_mode = #tpu.pipeline_mode<synchronous>, transform_indices = @transform_5, window_bounds = array<i64: 128, 24>}, {pipeline_mode = #tpu.pipeline_mode<synchronous>, transform_indices = @transform_6, window_bounds = array<i64: 1, 24>}, {pipeline_mode = #tpu.pipeline_mode<synchronous>, transform_indices = @transform_7, window_bounds = array<i64: 1, 256>}, {pipeline_mode = #tpu.pipeline_mode<synchronous>, transform_indices = @transform_8, window_bounds = array<i64: 1, 1>}, {transform_indices = @transform_9, window_bounds = array<i64: 24, 24>}, {transform_indices = @transform_10, window_bounds = array<i64: 24, 1>}]} {
    %c0 = arith.constant 0 : index
    %c0_0 = arith.constant 0 : index
    %0 = vector.load %arg1[%c0, %c0_0] : memref<24x128xbf16, #tpu.memory_space<vmem>>, vector<24x128xbf16>
    %c0_1 = arith.constant 0 : index
    %c0_2 = arith.constant 0 : index
    %1 = vector.load %arg2[%c0_1, %c0_2] : memref<128x512xbf16, #tpu.memory_space<vmem>>, vector<128x512xbf16>
    %cst = arith.constant dense<0.000000e+00> : vector<24x512xf32>
    %2 = tpu.matmul %0, %1, %cst {dimension_numbers = #tpu.dot_dimension_numbers<[1], [0], [0], [1], [0, 0, 1, 1], [], []>} : vector<24x128xbf16>, vector<128x512xbf16>, vector<24x512xf32> -> vector<24x512xf32>
    %c0_3 = arith.constant 0 : index
    %c0_4 = arith.constant 0 : index
    %3 = vector.load %arg3[%c0_3, %c0_4] : memref<1x512xf32, #tpu.memory_space<vmem>>, vector<1x512xf32>
    %4 = vector.broadcast %3 : vector<1x512xf32> to vector<24x512xf32>
    %5 = arith.addf %2, %4 : vector<24x512xf32>
    %cst_5 = arith.constant 0.000000e+00 : f32
    %6 = vector.broadcast %cst_5 : f32 to vector<24x512xf32>
    %7 = arith.maximumf %5, %6 : vector<24x512xf32>
    %8 = vector.extract_strided_slice %7 {offsets = [0, 0], sizes = [24, 256], strides = [1, 1]} : vector<24x512xf32> to vector<24x256xf32>
    %9 = vector.extract_strided_slice %7 {offsets = [0, 256], sizes = [24, 256], strides = [1, 1]} : vector<24x512xf32> to vector<24x256xf32>
    %10 = arith.truncf %8 : vector<24x256xf32> to vector<24x256xbf16>
    %c0_6 = arith.constant 0 : index
    %c0_7 = arith.constant 0 : index
    %11 = vector.load %arg4[%c0_6, %c0_7] : memref<256x128xbf16, #tpu.memory_space<vmem>>, vector<256x128xbf16>
    %cst_8 = arith.constant dense<0.000000e+00> : vector<24x128xf32>
    %12 = tpu.matmul %10, %11, %cst_8 {dimension_numbers = #tpu.dot_dimension_numbers<[1], [0], [0], [1], [0, 0, 1, 1], [], []>} : vector<24x256xbf16>, vector<256x128xbf16>, vector<24x128xf32> -> vector<24x128xf32>
    %c0_9 = arith.constant 0 : index
    %c0_10 = arith.constant 0 : index
    %13 = vector.load %arg5[%c0_9, %c0_10] : memref<1x128xf32, #tpu.memory_space<vmem>>, vector<1x128xf32>
    %14 = vector.broadcast %13 : vector<1x128xf32> to vector<24x128xf32>
    %15 = arith.addf %12, %14 : vector<24x128xf32>
    %cst_11 = arith.constant 0.000000e+00 : f32
    %16 = vector.broadcast %cst_11 : f32 to vector<24x128xf32>
    %17 = arith.maximumf %15, %16 : vector<24x128xf32>
    %18 = arith.truncf %17 : vector<24x128xf32> to vector<24x128xbf16>
    %c0_12 = arith.constant 0 : index
    %c0_13 = arith.constant 0 : index
    %19 = vector.load %arg6[%c0_12, %c0_13] : memref<128x24xbf16, #tpu.memory_space<vmem>>, vector<128x24xbf16>
    %cst_14 = arith.constant dense<0.000000e+00> : vector<24x24xf32>
    %20 = tpu.matmul %18, %19, %cst_14 {dimension_numbers = #tpu.dot_dimension_numbers<[1], [0], [0], [1], [0, 0, 1, 1], [], []>} : vector<24x128xbf16>, vector<128x24xbf16>, vector<24x24xf32> -> vector<24x24xf32>
    %c0_15 = arith.constant 0 : index
    %c0_16 = arith.constant 0 : index
    %21 = vector.load %arg7[%c0_15, %c0_16] : memref<1x24xf32, #tpu.memory_space<vmem>>, vector<1x24xf32>
    %22 = vector.broadcast %21 : vector<1x24xf32> to vector<24x24xf32>
    %23 = arith.addf %20, %22 : vector<24x24xf32>
    %c0_17 = arith.constant 0 : index
    %c0_18 = arith.constant 0 : index
    %24 = vector.load %arg10[%c0_17, %c0_18] : memref<24x24xf32, #tpu.memory_space<vmem>>, vector<24x24xf32>
    tpu.vector_store %arg10[%c0_17, %c0_18], %23 {strides = array<i32>} : memref<24x24xf32, #tpu.memory_space<vmem>>, vector<24x24xf32>,
    %c0_19 = arith.constant 0 : index
    %c0_20 = arith.constant 0 : index
    %25 = vector.load %arg8[%c0_19, %c0_20] : memref<1x256xf32, #tpu.memory_space<vmem>>, vector<1x256xf32>
    %26 = vector.broadcast %25 : vector<1x256xf32> to vector<24x256xf32>
    %27 = arith.mulf %9, %26 : vector<24x256xf32>
    %cst_21 = arith.constant dense<0.000000e+00> : vector<24xf32>
    %28 = vector.multi_reduction <add>, %27, %cst_21 [1] : vector<24x256xf32> to vector<24xf32>
    %29 = vector.shape_cast %28 : vector<24xf32> to vector<24x1xf32>
    %c0_22 = arith.constant 0 : index
    %c0_23 = arith.constant 0 : index
    %30 = vector.load %arg9[%c0_22, %c0_23] : memref<1x1xf32, #tpu.memory_space<vmem>>, vector<1x1xf32>
    %31 = vector.broadcast %30 : vector<1x1xf32> to vector<24x1xf32>
    %32 = arith.addf %29, %31 : vector<24x1xf32>
    %33 = tpu.iota {dimensions = array<i32: 0>} : vector<24x4xi32>
    %34 = tpu.iota {dimensions = array<i32: 1>} : vector<24x4xi32>
    %c6_i32 = arith.constant 6 : i32
    %35 = vector.broadcast %c6_i32 : i32 to vector<24x4xi32>
    %36 = arith.muli %34, %35 : vector<24x4xi32>
    %37 = arith.cmpi sge, %33, %36 : vector<24x4xi32>
    %c6_i32_24 = arith.constant 6 : i32
    %38 = vector.broadcast %c6_i32_24 : i32 to vector<24x4xi32>
    %39 = arith.addi %36, %38 : vector<24x4xi32>
    %40 = arith.cmpi slt, %33, %39 : vector<24x4xi32>
    %41 = arith.andi %37, %40 : vector<24x4xi1>
    %42 = arith.extui %41 : vector<24x4xi1> to vector<24x4xi32>
    %43 = arith.sitofp %42 : vector<24x4xi32> to vector<24x4xf32>
    %cst_25 = arith.constant 0xFF800000 : f32
    %44 = vector.shape_cast %32 : vector<24x1xf32> to vector<24x1xf32>
    %45 = vector.broadcast %44 : vector<24x1xf32> to vector<24x4xf32>
    %46 = vector.broadcast %cst_25 : f32 to vector<24x4xf32>
    %47 = arith.select %41, %45, %46 : vector<24x4xi1>, vector<24x4xf32>
    %cst_26 = arith.constant dense<0xFF800000> : vector<4xf32>
    %48 = vector.multi_reduction <maximumf>, %47, %cst_26 [0] : vector<24x4xf32> to vector<4xf32>
    %49 = vector.shape_cast %48 : vector<4xf32> to vector<1x4xf32>
    %50 = vector.broadcast %49 : vector<1x4xf32> to vector<24x4xf32>
    %51 = arith.mulf %43, %50 : vector<24x4xf32>
    %cst_27 = arith.constant dense<0.000000e+00> : vector<24xf32>
    %52 = vector.multi_reduction <add>, %51, %cst_27 [1] : vector<24x4xf32> to vector<24xf32>
    %53 = vector.shape_cast %52 : vector<24xf32> to vector<24x1xf32>
    %54 = arith.subf %32, %53 : vector<24x1xf32>
    %55 = math.exp %54 : vector<24x1xf32>
    %56 = vector.broadcast %55 : vector<24x1xf32> to vector<24x4xf32>
    %57 = arith.mulf %43, %56 : vector<24x4xf32>
    %cst_28 = arith.constant dense<0.000000e+00> : vector<4xf32>
    %58 = vector.multi_reduction <add>, %57, %cst_28 [0] : vector<24x4xf32> to vector<4xf32>
    %59 = vector.shape_cast %58 : vector<4xf32> to vector<1x4xf32>
    %60 = vector.broadcast %59 : vector<1x4xf32> to vector<24x4xf32>
    %61 = arith.mulf %43, %60 : vector<24x4xf32>
    %cst_29 = arith.constant dense<0.000000e+00> : vector<24xf32>
    %62 = vector.multi_reduction <add>, %61, %cst_29 [1] : vector<24x4xf32> to vector<24xf32>
    %63 = vector.shape_cast %62 : vector<24xf32> to vector<24x1xf32>
    %64 = tpu.reciprocal %63 {approx = true} : vector<24x1xf32> -> vector<24x1xf32>
    %65 = arith.mulf %55, %64 : vector<24x1xf32>
    %c0_30 = arith.constant 0 : index
    %c0_31 = arith.constant 0 : index
    %66 = vector.load %arg11[%c0_30, %c0_31] : memref<24x1xf32, #tpu.memory_space<vmem>>, vector<24x1xf32>
    tpu.vector_store %arg11[%c0_30, %c0_31], %65 {strides = array<i32>} : memref<24x1xf32, #tpu.memory_space<vmem>>, vector<24x1xf32>,
    return
  }
  func.func @transform_0(%arg0: i32) -> (i32, i32) {
    %c0_i32 = arith.constant 0 : i32
    %c0_i32_0 = arith.constant 0 : i32
    return %arg0, %c0_i32 : i32, i32
  }
  func.func @transform_1(%arg0: i32) -> (i32, i32) {
    %c0_i32 = arith.constant 0 : i32
    %c0_i32_0 = arith.constant 0 : i32
    %c0_i32_1 = arith.constant 0 : i32
    return %c0_i32, %c0_i32_0 : i32, i32
  }
  func.func @transform_2(%arg0: i32) -> (i32, i32) {
    %c0_i32 = arith.constant 0 : i32
    %c0_i32_0 = arith.constant 0 : i32
    %c0_i32_1 = arith.constant 0 : i32
    return %c0_i32, %c0_i32_0 : i32, i32
  }
  func.func @transform_3(%arg0: i32) -> (i32, i32) {
    %c0_i32 = arith.constant 0 : i32
    %c0_i32_0 = arith.constant 0 : i32
    %c0_i32_1 = arith.constant 0 : i32
    return %c0_i32, %c0_i32_0 : i32, i32
  }
  func.func @transform_4(%arg0: i32) -> (i32, i32) {
    %c0_i32 = arith.constant 0 : i32
    %c0_i32_0 = arith.constant 0 : i32
    %c0_i32_1 = arith.constant 0 : i32
    return %c0_i32, %c0_i32_0 : i32, i32
  }
  func.func @transform_5(%arg0: i32) -> (i32, i32) {
    %c0_i32 = arith.constant 0 : i32
    %c0_i32_0 = arith.constant 0 : i32
    %c0_i32_1 = arith.constant 0 : i32
    return %c0_i32, %c0_i32_0 : i32, i32
  }
  func.func @transform_6(%arg0: i32) -> (i32, i32) {
    %c0_i32 = arith.constant 0 : i32
    %c0_i32_0 = arith.constant 0 : i32
    %c0_i32_1 = arith.constant 0 : i32
    return %c0_i32, %c0_i32_0 : i32, i32
  }
  func.func @transform_7(%arg0: i32) -> (i32, i32) {
    %c0_i32 = arith.constant 0 : i32
    %c0_i32_0 = arith.constant 0 : i32
    %c0_i32_1 = arith.constant 0 : i32
    return %c0_i32, %c0_i32_0 : i32, i32
  }
  func.func @transform_8(%arg0: i32) -> (i32, i32) {
    %c0_i32 = arith.constant 0 : i32
    %c0_i32_0 = arith.constant 0 : i32
    %c0_i32_1 = arith.constant 0 : i32
    return %c0_i32, %c0_i32_0 : i32, i32
  }
  func.func @transform_9(%arg0: i32) -> (i32, i32) {
    %c0_i32 = arith.constant 0 : i32
    %c0_i32_0 = arith.constant 0 : i32
    return %arg0, %c0_i32 : i32, i32
  }
  func.func @transform_10(%arg0: i32) -> (i32, i32) {
    %c0_i32 = arith.constant 0 : i32
    %c0_i32_0 = arith.constant 0 : i32
    return %arg0, %c0_i32 : i32, i32
  }
}

</mosaic_0001>

<bundles_post_ra>
// kernel: tpu_custom_call.1
= control target key start
LH: loop header
LB: loop body
LE: loop exit
PB: predicated region body
PF: predicated region fallthrough
CT: control target
= control target key end

     0   :  { %s1971_s0 = inlined_call_operand.vmem [shape: bf16[48,128], index: 0, kind: input, shape index: {}]   ;;  %s1972_s1 = inlined_call_operand.hbm [shape: bf16[128,512], index: 1, kind: input, shape index: {}]   ;;  %s1973_s2 = inlined_call_operand.vmem [shape: f32[1,512], index: 2, kind: input, shape index: {}]   ;;  %s1974_s3 = inlined_call_operand.hbm [shape: bf16[256,128], index: 3, kind: input, shape index: {}]   ;;  %s1975_s4 = inlined_call_operand.vmem [shape: f32[1,128], index: 4, kind: input, shape index: {}]   ;;  %s1976_s5 = inlined_call_operand.vmem [shape: bf16[128,24], index: 5, kind: input, shape index: {}]   ;;  %s1977_s6 = inlined_call_operand.vmem [shape: f32[1,24], index: 6, kind: input, shape index: {}]   ;;  %s1978_s7 = inlined_call_operand.vmem [shape: f32[1,256], index: 7, kind: input, shape index: {}]   ;;  %s1979_s8 = inlined_call_operand.<no memory space> [shape: f32[1,1], index: 8, kind: input, shape index: {}]   ;;  %s1980_s9 = inlined_call_operand.vmem [shape: f32[48,24], index: 9, kind: output, shape index: {0}]   ;;  %s1981_s10 = inlined_call_operand.vmem [shape: f32[48,1], index: 10, kind: output, shape index: {1}]  }
   0x1   :  { %v16_v0 = vstv %s1979_s8 }
   0x2   :  { %17 = vst [vmem:[#allocation2] sm:$0x1] %v16_v0 }
   0x3   :  { %18 = vsyncpa [#allocation4], 0 }
   0x4   :  { %19 = vsyncpa [#allocation6], 0  ;;  %s1737_s15 = smov 0  }
   0x5 LB: > { %s1671_s16 = smov [#allocation3]   ;;  %s1340_s18 = sadd.s32 4294967295, %s1669_s15   ;;  %s1669_s15 = sphi %s1737_s15, %s25_s15  }
   0x6   : > { %s288_s17 = sshll.u32 %s1671_s16, 4  ;;  %p1342_p0 = scmp.ge.s32.totalorder %s1669_s15, 1  ;;  %s289_s17 = int_to_ptr.vmem [resolvable:$true] %s288_s17 }
   0x7   : > { %p276_p1 = scmp.lt.s32.totalorder %s1669_s15, 3  ;;  %p1751_p3 = scmp.eq.s32.totalorder %s1340_s18, 0 }
   0x8   : > { %s1672_s20 = smov [#allocation5]   ;;  %s1599_s25 = scalar_lea.hbm %s1972_s1, 4096 }
   0x9   : > { %p1745_p2 = pnand %p1342_p0, %p276_p1  ;;  %s304_s21 = sshll.u32 %s1672_s20, 4  ;;  %s1763_s21 = int_to_ptr.vmem [resolvable:$true] %s304_s21 }
   0xa   : > { %s1986_s19 = scalar_select %p1751_p3, 1, 0 }
   0xb   : > { %s1985_s8 = scalar_select %p1745_p2, 1, 0 }
   0xc   : > { %p1484_p4 = pneg %p1745_p2  ;;  %p1600_p6 = scmp.ne.s32.totalorder %s1972_s1, %s1599_s25 }
   0xd   : > { %p1606_p10 = scmp.lt.u32.totalorder %s1599_s25, %s1972_s1 }
   0xe   : > { %p1759_p5 = pnand %p1751_p3, %p1484_p4 }
  0x10   : > { %p1601_p7 = pneg %p1759_p5 }
  0x12   : > { %p1602_p8 = pnand %p1601_p7, %p1600_p6 }
  0x14   : > { %p1603_p9 = pneg %p1602_p8 }
  0x16   : > { %p1608_p11 = pnand %p1606_p10, %p1603_p9 }
  0x18   : > { %1611 = shalt.err (!%p1608_p11)
}
  0x19   : > { %s1612_s30 = scalar_lea.vmem %s289_s17, 4096  ;;  %p1620_p1 = scmp.lt.s32.totalorder %s289_s17, %s289_s17 }
  0x1a   : > { %p1613_p12 = scmp.ne.s32.totalorder %s289_s17, %s1612_s30  ;;  %p1621_p4 = scmp.lt.s32.totalorder %s1612_s30, %s1612_s30 }
  0x1c   : > { %p1615_p13 = pnand %p1613_p12, %p1601_p7  ;;  %p1622_p3 = por %p1621_p4, %p1620_p1 }
  0x1e   : > { %p1616_p0 = pneg %p1615_p13 }
  0x20   : > { %p1623_p2 = pnand %p1622_p3, %p1616_p0 }
  0x22   : > { %1626 = shalt.err (!%p1623_p2)
}
  0x23   : > { %s1673_s11 = smov 256   ;;  %s1674_s12 = smov 16  }
  0x24   : > { %1487 = dma.hbm_to_vmem [thread:$0]  (!%p1759_p5), %s1972_s1, 4096, %s289_s17, [#allocation4], %s1673_s11, %s1673_s11, %s1674_s12  }
  0x25   : > { %s1627_s23 = scalar_lea.hbm %s1974_s3, 2048 }
  0x26   : > { %p1628_p6 = scmp.ne.s32.totalorder %s1974_s3, %s1627_s23  ;;  %p1634_p8 = scmp.lt.u32.totalorder %s1627_s23, %s1974_s3 }
  0x28   : > { %p1630_p2 = pnand %p1628_p6, %p1601_p7 }
  0x2a   : > { %p1631_p3 = pneg %p1630_p2 }
  0x2c   : > { %p1636_p9 = pnand %p1634_p8, %p1631_p3 }
  0x2e   : > { %1639 = shalt.err (!%p1636_p9)
}
  0x2f   : > { %s1640_s17 = scalar_lea.vmem %s1763_s21, 2048  ;;  %p1648_p13 = scmp.lt.s32.totalorder %s1763_s21, %s1763_s21 }
  0x30   : > { %p1641_p10 = scmp.ne.s32.totalorder %s1763_s21, %s1640_s17  ;;  %p1649_p0 = scmp.lt.s32.totalorder %s1640_s17, %s1640_s17 }
  0x32   : > { %p1643_p11 = pnand %p1641_p10, %p1601_p7  ;;  %p1650_p1 = por %p1649_p0, %p1648_p13 }
  0x34   : > { %p1644_p12 = pneg %p1643_p11 }
  0x36   : > { %p1651_p4 = pnand %p1650_p1, %p1644_p12 }
  0x38   : > { %1654 = shalt.err (!%p1651_p4)
}
  0x39   : > { %s1675_s28 = smov 64   ;;  %s1676_s29 = smov 4  }
  0x3a   : > { %1490 = dma.hbm_to_vmem [thread:$0]  (!%p1759_p5), %s1974_s3, 2048, %s1763_s21, [#allocation6], %s1675_s28, %s1675_s28, %s1676_s29  }
  0x3b   : > { %p1988_p6 = scmp.ne.s32.totalorder %s1985_s8, 0 }
  0x3c   : > { %p1989_p7 = scmp.ne.s32.totalorder (!%p1988_p6), %s1986_s19, 0 }
  0x3d   : > { %344 = sbr.rel (%p1988_p6) target bundleno = 1098 (0x44a), region = 56 }
  0x44   : > { %1660 = dma.done.wait (%p1989_p7), [#allocation4], 4096  }
  0x45   : > { %1662 = vsyncadd (%p1989_p7), [#allocation4], 4294963200 }
  0x46   : > { %1664 = dma.done.wait (%p1989_p7), [#allocation6], 2048  }
  0x47   : > { %1666 = vsyncadd (%p1989_p7), [#allocation6], 4294965248  ;;  %v1677_v1 = vmov 0   ;;  %s391_s21 = smul.u32 3, %s1340_s18  ;;  %v1513_v2 = vld [vmem:[#allocation3 + $0xc] ss:$16 sps:$4 sm:$0xff]   ;;  %v447_v36 = vlaneseq }
  0x48   : > { %720 = vmatprep.mubr.bf16.mxu1 %v1677_v1  ;;  %669 = vmatprep.mubr.bf16.mxu0 %v1677_v1  ;;  %v1515_v3 = vld [vmem:[#allocation3 + $0x8] ss:$16 sps:$4 sm:$0xff]   ;;  %v1516_v4 = vld [vmem:[#allocation3 + $0x2c] ss:$16 sps:$4 sm:$0xff]   ;;  %v1539_v20 = vld [vmem:[#allocation3 + $0x4] ss:$16 sps:$4 sm:$0xff]  }
  0x49   : > { %1511 = vset.pattern.permute.xlu1 %v1677_v1  ;;  %1512 = vset.pattern.permute.xlu0 %v1677_v1  ;;  %p392_p5 = scmp.lt.s32.totalorder %s391_s21, 5  ;;  %v1518_v5 = vld [vmem:[#allocation3 + $0x28] ss:$16 sps:$4 sm:$0xff]   ;;  %v1519_v6 = vld [vmem:[#allocation3 + $0x4c] ss:$16 sps:$4 sm:$0xff]   ;;  %v1837_v37 = vshrl.u32 %v447_v36, 7 }
  0x4a   : > { %688 = vmatprep.subr.bf16.mxu1 %v1513_v2  ;;  %v1521_v7 = vld [vmem:[#allocation3 + $0x48] ss:$16 sps:$4 sm:$0xff]   ;;  %v1522_v8 = vld [vmem:[#allocation3 + $0x6c] ss:$16 sps:$4 sm:$0xff]   ;;  %v1541_v21 = vld [vmem:[#allocation3] ss:$16 sps:$4 sm:$0xff]   ;;  %637 = vmatprep.subr.bf16.mxu0 %v1539_v20 }
  0x4b   : > { %s1997_s21 = smov (!%p392_p5, %s391_s21), 5  ;;  %689 = vmatpush1.bf16.msra.mxu1 %v1515_v3  ;;  %v1524_v9 = vld [vmem:[#allocation3 + $0x68] ss:$16 sps:$4 sm:$0xff]   ;;  %v1525_v10 = vld [vmem:[#allocation3 + $0x8c] ss:$16 sps:$4 sm:$0xff]   ;;  %638 = vmatpush1.bf16.msra.mxu0 %v1541_v21  ;;  %v457_v38 = vsub.s32 2, %v1837_v37 }
  0x4c   : > { %690 = vmatprep.subr.bf16.mxu1 %v1516_v4  ;;  %s1349_s8 = sshll.u32 %s1997_s21, 2  ;;  %v1527_v11 = vld [vmem:[#allocation3 + $0x88] ss:$16 sps:$4 sm:$0xff]   ;;  %v1528_v12 = vld [vmem:[#allocation3 + $0xac] ss:$16 sps:$4 sm:$0xff]   ;;  %v461_v40 = vsub.s32 3, %v1837_v37 }
  0x4d   : > { %s395_s22 = scalar_lea.vmem %s1971_s0, %s1349_s8  ;;  %v1530_v13 = vld [vmem:[#allocation3 + $0xa8] ss:$16 sps:$4 sm:$0xff]   ;;  %v1531_v14 = vld [vmem:[#allocation3 + $0xcc] ss:$16 sps:$4 sm:$0xff]   ;;  %v1542_v22 = vld [vmem:[#allocation3 + $0x24] ss:$16 sps:$4 sm:$0xff]  }
  0x4e   : > { %v1533_v15 = vld [vmem:[#allocation3 + $0xc8] ss:$16 sps:$4 sm:$0xff]   ;;  %v1534_v16 = vld [vmem:[#allocation3 + $0xec] ss:$16 sps:$4 sm:$0xff]   ;;  %v1538_v19 = vld [vmem:[%s395_s22 + $0x8] ss:$0 sps:$4 sm:$0xff]   ;;  %639 = vmatprep.subr.bf16.mxu0 %v1542_v22 }
  0x4f   : > { %691 = vmatpush1.bf16.msra.mxu1 %v1518_v5  ;;  %v1536_v17 = vld [vmem:[#allocation3 + $0xe8] ss:$16 sps:$4 sm:$0xff]   ;;  %v1537_v18 = vld [vmem:[%s395_s22] sm:$0xff]   ;;  %v449_v42 = vsub.s32 0, %v1837_v37  ;;  %v453_v45 = vsub.s32 1, %v1837_v37  ;;  %vm1144_vm8 = vcmask 31744  }
  0x50   : > { %692 = vmatprep.subr.bf16.mxu1 %v1519_v6  ;;  %v1544_v23 = vld [vmem:[#allocation3 + $0x20] ss:$16 sps:$4 sm:$0xff]   ;;  %v1545_v24 = vld [vmem:[#allocation3 + $0x44] ss:$16 sps:$4 sm:$0xff]   ;;  %v1565_v22 = vld [vmem:[#allocation5 + $0x48] sm:$0xff]   ;;  %s1350_s16 = sshll.u32 %s1997_s21, 3 }
  0x51   : > { %640 = vmatpush1.bf16.msra.mxu0 %v1544_v23  ;;  %v1547_v25 = vld [vmem:[#allocation3 + $0x40] ss:$16 sps:$4 sm:$0xff]   ;;  %v1548_v26 = vld [vmem:[#allocation3 + $0x64] ss:$16 sps:$4 sm:$0xff]   ;;  %v1566_v23 = vld [vmem:[#allocation5 + $0x8] sm:$0xff]   ;;  %s401_s26 = scalar_lea.vmem %s1980_s9, %s1350_s16  ;;  %vm1062_vm10 = vcmask 195584   ;;  %s407_s17 = scalar_lea.vmem %s1981_s10, %s1350_s16 }
  0x52   : > { %641 = vmatprep.subr.bf16.mxu0 %v1545_v24  ;;  %v1550_v27 = vld [vmem:[#allocation3 + $0x60] ss:$16 sps:$4 sm:$0xff]   ;;  %v1551_v28 = vld [vmem:[#allocation3 + $0x84] ss:$16 sps:$4 sm:$0xff]   ;;  %vm1224_vm11 = vcmask 7168  }
  0x53   : > { %693 = vmatpush1.bf16.msra.mxu1 %v1521_v7  ;;  %v1553_v29 = vld [vmem:[#allocation3 + $0x80] ss:$16 sps:$4 sm:$0xff]   ;;  %v1554_v30 = vld [vmem:[#allocation3 + $0xa4] ss:$16 sps:$4 sm:$0xff]  }
  0x54   : > { %694 = vmatprep.subr.bf16.mxu1 %v1522_v8  ;;  %v1556_v31 = vld [vmem:[#allocation3 + $0xa0] ss:$16 sps:$4 sm:$0xff]   ;;  %v1557_v32 = vld [vmem:[#allocation3 + $0xc4] ss:$16 sps:$4 sm:$0xff]  }
  0x55   : > { %642 = vmatpush1.bf16.msra.mxu0 %v1547_v25  ;;  %v1559_v33 = vld [vmem:[#allocation3 + $0xc0] ss:$16 sps:$4 sm:$0xff]   ;;  %v1560_v34 = vld [vmem:[#allocation3 + $0xe4] ss:$16 sps:$4 sm:$0xff]  }
  0x56   : > { %643 = vmatprep.subr.bf16.mxu0 %v1548_v26  ;;  %v1562_v35 = vld [vmem:[#allocation3 + $0xe0] ss:$16 sps:$4 sm:$0xff]   ;;  %v1569_v26 = vld [vmem:[#allocation5 + $0x58] sm:$0xff]  }
  0x57   : > { %695 = vmatpush1.bf16.msra.mxu1 %v1524_v9  ;;  %v1843_v39 = vld [vmem:[%s1973_s2] sm:$0xf]  ;;  %v1567_v24 = vld [vmem:[#allocation5 + $0x50] sm:$0xff]  }
  0x58   : > { %696 = vmatprep.subr.bf16.mxu1 %v1525_v10  ;;  %v458_v41 = vrot.slane %v1843_v39, %v457_v38  ;;  %v462_v43 = vrot.slane %v1843_v39, %v461_v40  ;;  %v1066_v44 = vld [vmem:[%s1978_s7] sm:$0x3]  ;;  %v1568_v25 = vld [vmem:[#allocation5 + $0x10] sm:$0xff]  }
  0x59   : > { %644 = vmatpush1.bf16.msra.mxu0 %v1550_v27  ;;  %v1071_v49 = vrot.slane %v1066_v44, %v449_v42  ;;  %v1075_v52 = vrot.slane %v1066_v44, %v453_v45  ;;  %v1563_v20 = vld [vmem:[#allocation5 + $0x40] sm:$0xff]   ;;  %v1570_v27 = vld [vmem:[#allocation5 + $0x18] sm:$0xff]   ;;  %v1576_v44 = vld [vmem:[#allocation5 + $0x30] sm:$0xff]  }
  0x5a   : > { %645 = vmatprep.subr.bf16.mxu0 %v1551_v28  ;;  %v1564_v21 = vld [vmem:[#allocation5] sm:$0xff]  }
  0x5b   : > { %697 = vmatpush1.bf16.msra.mxu1 %v1527_v11  ;;  %v1571_v28 = vld [vmem:[#allocation5 + $0x60] sm:$0xff]  }
  0x5c   : > { %698 = vmatprep.subr.bf16.mxu1 %v1528_v12 }
  0x5d   : > { %646 = vmatpush1.bf16.msra.mxu0 %v1553_v29  ;;  %v1572_v29 = vld [vmem:[#allocation5 + $0x20] sm:$0xff]  }
  0x5e   : > { %647 = vmatprep.subr.bf16.mxu0 %v1554_v30  ;;  %v1573_v30 = vld [vmem:[#allocation5 + $0x68] sm:$0xff]  }
  0x5f   : > { %699 = vmatpush1.bf16.msra.mxu1 %v1530_v13  ;;  %v1412_v13 = vld [vmem:[#allocation2] ss:$0 sm:$0xff] }
  0x60   : > { %700 = vmatprep.subr.bf16.mxu1 %v1531_v14 }
  0x61   : > { %648 = vmatpush1.bf16.msra.mxu0 %v1556_v31  ;;  %v450_v31 = vrot.slane %v1843_v39, %v449_v42 }
  0x62   : > { %649 = vmatprep.subr.bf16.mxu0 %v1557_v32 }
  0x63   : > { %701 = vmatpush1.bf16.msra.mxu1 %v1533_v15 }
  0x64   : > { %702 = vmatprep.subr.bf16.mxu1 %v1534_v16 }
  0x65   : > { %650 = vmatpush1.bf16.msra.mxu0 %v1559_v33  ;;  %v1574_v33 = vld [vmem:[#allocation5 + $0x28] sm:$0xff]  }
  0x66   : > { %651 = vmatprep.subr.bf16.mxu0 %v1560_v34  ;;  %v454_v34 = vrot.slane %v1843_v39, %v453_v45  ;;  %v1578_v39 = vld [vmem:[#allocation5 + $0x38] sm:$0xff]  }
  0x67   : > { %703 = vmatpush1.bf16.msra.mxu1 %v1536_v17 }
  0x69   : > { %652 = vmatpush1.bf16.msra.mxu0 %v1562_v35  ;;  %v1575_v35 = vld [vmem:[#allocation5 + $0x70] sm:$0xff]  }
  0x6a   : > { %721 = vmatmul.mubr.bf16.vlgmr.msra.gmra.mrb[0].mxu1 %v1537_v18  ;;  %1418 = vmatprep.subr.bf16.mxu0 %v1563_v20 }
  0x6b   : > { %730 = vmatprep.mubr.bf16.mxu1 %v1677_v1 }
  0x6c   : > { %670 = vmatmul.mubr.bf16.vlgmr.msra.gmra.mrb[0].mxu0 %v1537_v18 }
  0x6d   : > { %679 = vmatprep.mubr.bf16.mxu0 %v1677_v1  ;;  %1419 = vmatpush3.bf16.msra.mxu0 %v1564_v21 }
  0x6e   : > { %1420 = vmatprep.subr.bf16.mxu0 %v1565_v22 }
  0x71   : > { %1421 = vmatpush3.bf16.msra.mxu0 %v1566_v23 }
  0x72   : > { %731 = vmatmul.mubr.bf16.gmra.mrb[4].mxu1 %v1538_v19  ;;  %1422 = vmatprep.subr.bf16.mxu0 %v1567_v24 }
  0x74   : > { %680 = vmatmul.mubr.bf16.gmra.mrb[4].mxu0 %v1538_v19 }
  0x75   : > { %1423 = vmatpush3.bf16.msra.mxu0 %v1568_v25  ;;  %v1678_v25 = vmov 0.0  }
  0x76   : > { %1424 = vmatprep.subr.bf16.mxu0 %v1569_v26 }
  0x79   : > { %1425 = vmatpush3.bf16.msra.mxu0 %v1570_v27 }
  0x7a   : > { %1426 = vmatprep.subr.bf16.mxu0 %v1571_v28 }
  0x7d   : > { %1427 = vmatpush3.bf16.msra.mxu0 %v1572_v29 }
  0x7e   : > { %1428 = vmatprep.subr.bf16.mxu0 %v1573_v30 }
  0x81   : > { %1429 = vmatpush3.bf16.msra.mxu0 %v1574_v33 }
  0x82   : > { %1430 = vmatprep.subr.bf16.mxu0 %v1575_v35 }
  0x85   : > { %1431 = vmatpush3.bf16.msra.mxu0 %v1576_v44  ;;  %v1583_v44 = vld [vmem:[%s1976_s5 + $0x20] sm:$0xff]  }
 0x13d   : > { %v722_v46 = vpop.f32.mrb[0].mxu1 }
 0x13e   : > { %v723_v47 = vadd.f32 %v722_v46, %v458_v41  ;;  %v724_v48 = vpop.f32.mrb[1].mxu1 }
 0x13f   : > { %v725_v50 = vadd.f32 %v724_v48, %v462_v43  ;;  %v726_v51 = vpop.f32.mrb[2].mxu1  ;;  %v671_v32 = vpop.f32.mrb[0].mxu0  ;;  %v1577_v48 = vld [vmem:[#allocation5 + $0x78] sm:$0xff]  }
 0x140   : > { %v741_v53 = vmax.f32 %v723_v47, 0.0  ;;  %v727_v54 = vadd.f32 %v726_v51, %v458_v41  ;;  %v728_v55 = vpop.f32.mrb[3].mxu1  ;;  %v673_v38 = vpop.f32.mrb[1].mxu0  ;;  %v672_v40 = vadd.f32 %v671_v32, %v450_v31  ;;  %1432 = vmatprep.subr.bf16.mxu0 %v1577_v48  ;;  %v1586_v48 = vld [vmem:[%s1976_s5 + $0x38] sm:$0xff]  }
 0x141   : > { %v742_v56 = vmax.f32 %v725_v50, 0.0  ;;  %v729_v57 = vadd.f32 %v728_v55, %v462_v43  ;;  %1433 = vmatpush3.bf16.msra.mxu0 %v1578_v39 }
 0x142   : > { %v745_v58 = vmax.f32 %v727_v54, 0.0  ;;  %v1078_v59 = vmul.f32 %v1071_v49, %v741_v53 }
 0x143   : > { %v746_v60 = vmax.f32 %v729_v57, 0.0  ;;  %v1079_v61 = vmul.f32 %v1075_v52, %v742_v56 }
 0x144   : > { %v1080_v62 = vmul.f32 %v1071_v49, %v745_v58 }
 0x145   : > { %v1081_v63 = vmul.f32 %v1075_v52, %v746_v60  ;;  %v732_v0 = vpop.f32.mrb[4].mxu1  ;;  %v1084_v1 = vadd.f32 %v1079_v61, %v1078_v59 }
 0x146   : > { %v733_v2 = vadd.f32 %v732_v0, %v458_v41  ;;  %v734_v3 = vpop.f32.mrb[5].mxu1  ;;  %v674_v41 = vadd.f32 %v673_v38, %v454_v34  ;;  %v1108_v0 = vand.u32 127, %v447_v36  ;;  %v1579_v38 = vld [vmem:[%s1976_s5] sm:$0xff]  }
 0x147   : > { %v735_v4 = vadd.f32 %v734_v3, %v462_v43  ;;  %v736_v5 = vpop.f32.mrb[6].mxu1  ;;  %1085 = vadd.xlane.f32.xlu0 %v1084_v1  ;;  %v1087_v6 = vadd.f32 %v1081_v63, %v1080_v62  ;;  %v675_v43 = vpop.f32.mrb[2].mxu0  ;;  %v1105_v3 = vadd.s32 8, %v1837_v37  ;;  %1456 = vmatprep.subr.bf16.mxu1 %v1579_v38 }
 0x148   : > { %v749_v7 = vmax.f32 %v733_v2, 0.0  ;;  %v737_v8 = vpop.f32.mrb[7].mxu1  ;;  %v676_v46 = vadd.f32 %v675_v43, %v450_v31  ;;  %v677_v47 = vpop.f32.mrb[3].mxu0  ;;  %v740_v42 = vmax.f32 %v674_v41, 0.0  ;;  %v1109_v1 = vmul.u32 6, %v1108_v0  ;;  %1457 = vmatpush3.bf16.msra.mxu1 %v1579_v38  ;;  %v1581_v41 = vld [vmem:[%s1976_s5 + $0x10] sm:$0xff]  }
 0x149   : > { %v750_v9 = vmax.f32 %v735_v4, 0.0  ;;  %v678_v50 = vadd.f32 %v677_v47, %v454_v34  ;;  %v681_v51 = vpop.f32.mrb[4].mxu0  ;;  %v1106_v4 = vadd.s32 16, %v1837_v37  ;;  %v1582_v43 = vld [vmem:[%s1976_s5 + $0x18] sm:$0xff]   ;;  %v1585_v47 = vld [vmem:[%s1976_s5 + $0x30] sm:$0xff]  }
 0x14a   : > { %v1082_v10 = vmul.f32 %v1071_v49, %v749_v7  ;;  %v739_v49 = vmax.f32 %v672_v40, 0.0  ;;  %v683_v53 = vpop.f32.mrb[5].mxu0  ;;  %v682_v60 = vadd.f32 %v681_v51, %v450_v31  ;;  %v1113_v2 = vadd.s32 6, %v1109_v1  ;;  %v1580_v40 = vld [vmem:[%s1976_s5 + $0x8] sm:$0xff]  }
 0x14b   : > { %1088 = vadd.xlane.f32.xlu0 %v1087_v6  ;;  %v1083_v11 = vmul.f32 %v1075_v52, %v750_v9  ;;  %v743_v52 = vmax.f32 %v676_v46, 0.0  ;;  %v744_v54 = vmax.f32 %v678_v50, 0.0  ;;  %v684_v45 = vadd.f32 %v683_v53, %v454_v34  ;;  %v685_v55 = vpop.f32.mrb[6].mxu0  ;;  %1458 = vmatprep.subr.bf16.mxu1 %v1580_v40  ;;  %v1584_v46 = vld [vmem:[%s1976_s5 + $0x28] sm:$0xff]  }
 0x14c   : > { %v686_v57 = vpop.f32.mrb[7].mxu0  ;;  %v747_v62 = vmax.f32 %v682_v60, 0.0  ;;  %vm1110_vm0 = vcmp.ge.s32.totalorder %v1837_v37, %v1109_v1  ;;  %vm1114_vm1 = vcmp.lt.s32.totalorder %v1837_v37, %v1113_v2  ;;  %vm1111_vm2 = vcmp.ge.s32.totalorder %v1105_v3, %v1109_v1  ;;  %1459 = vmatpush3.bf16.msra.mxu1 %v1580_v40 }
 0x14d   : > { %v1090_v12 = vadd.f32 %v1083_v11, %v1082_v10  ;;  %v751_v56 = vpack.c.bf16 %v743_v52, %v739_v49  ;;  %v752_v58 = vpack.c.bf16 %v744_v54, %v740_v42  ;;  %v748_v59 = vmax.f32 %v684_v45, 0.0  ;;  %vm1877_vm4 = vmand %vm1110_vm0, %vm1114_vm1  ;;  %1460 = vmatprep.subr.bf16.mxu1 %v1581_v41  ;;  %v1386_v42 = vld [vmem:[%s1975_s4] ss:$0 sm:$0xff] }
 0x14e   : > { %v753_v63 = vpack.c.bf16 %v747_v62, %v747_v62  ;;  %vm1115_vm3 = vcmp.lt.s32.totalorder %v1105_v3, %v1113_v2  ;;  %vm1112_vm6 = vcmp.ge.s32.totalorder %v1106_v4, %v1109_v1  ;;  %vm1116_vm7 = vcmp.lt.s32.totalorder %v1106_v4, %v1113_v2 }
 0x14f   : > { %1091 = vadd.xlane.f32.xlu1 %v1090_v12  ;;  %922 = vmatprep.mubr.bf16.mxu0 %v752_v58  ;;  %v754_v61 = vpack.c.bf16 %v748_v59, %v748_v59  ;;  %vm1881_vm5 = vmand %vm1111_vm2, %vm1115_vm3  ;;  %v1900_v26 = vsel %vm1877_vm4, 1.0, %v1678_v25 }
 0x150   : > { %923 = vmatmul.mubr.bf16.vlgmr.msra.gmra.mrb[8].mxu0 %v751_v56  ;;  %vm1890_vm9 = vmand %vm1112_vm6, %vm1116_vm7  ;;  %v1904_v27 = vsel %vm1881_vm5, 1.0, %v1678_v25  ;;  %1461 = vmatpush3.bf16.msra.mxu1 %v1581_v41 }
 0x151   : > { %930 = vmatprep.mubr.bf16.mxu0 %v754_v61  ;;  %v1908_v29 = vsel %vm1890_vm9, 1.0, %v1678_v25  ;;  %1462 = vmatprep.subr.bf16.mxu1 %v1582_v43 }
 0x154   : > { %1463 = vmatpush3.bf16.msra.mxu1 %v1582_v43 }
 0x155   : > { %1464 = vmatprep.subr.bf16.mxu1 %v1583_v44 }
 0x158   : > { %931 = vmatmul.mubr.bf16.gmra.mrb[12].mxu0 %v753_v63  ;;  %1465 = vmatpush3.bf16.msra.mxu1 %v1583_v44 }
 0x159   : > { %1466 = vmatprep.subr.bf16.mxu1 %v1584_v46 }
 0x15c   : > { %1467 = vmatpush3.bf16.msra.mxu1 %v1584_v46 }
 0x15d   : > { %1468 = vmatprep.subr.bf16.mxu1 %v1585_v47 }
 0x160   : > { %1469 = vmatpush3.bf16.msra.mxu1 %v1585_v47 }
 0x161   : > { %1470 = vmatprep.subr.bf16.mxu1 %v1586_v48 }
 0x164   : > { %1471 = vmatpush3.bf16.msra.mxu1 %v1586_v48 }
 0x1d4   : > { %v1086_v14 = vpop.xlane.xlu0 %1085 }
 0x1d5   : > { %v1857_v15 = vadd.f32 %v1412_v13, %v1086_v14 }
 0x1d7   : > { %1128 = vperm.xlu1 %1511, %v1857_v15  }
 0x1d8   : > { %v1089_v16 = vpop.xlane.xlu0 %1088 }
 0x1d9   : > { %v1860_v17 = vadd.f32 %v1412_v13, %v1089_v16 }
 0x1db   : > { %1133 = vperm.xlu0 %1512, %v1860_v17  }
 0x1dc   : > { %v1092_v18 = vpop.xlane.xlu1 %1091 }
 0x1dd   : > { %v1863_v19 = vadd.f32 %v1412_v13, %v1092_v18 }
 0x1df   : > { %1138 = vperm.xlu1 %1511, %v1863_v19  }
 0x223   : > { %v1434_v49 = vpop.f32.mrb[8].mxu0 }
 0x224   : > { %v1435_v50 = vpop.f32.mrb[9].mxu0 }
 0x225   : > { %v1436_v51 = vadd.f32 %v1435_v50, %v1434_v49  ;;  %v1437_v52 = vpop.f32.mrb[10].mxu0 }
 0x226   : > { %v1438_v53 = vpop.f32.mrb[11].mxu0 }
 0x227   : > { %v925_v54 = vadd.f32 %v1436_v51, %v1386_v42  ;;  %v1439_v39 = vadd.f32 %v1438_v53, %v1437_v52 }
 0x229   : > { %v938_v45 = vmax.f32 %v925_v54, 0.0  ;;  %v928_v55 = vadd.f32 %v1439_v39, %v1386_v42 }
 0x22b   : > { %v939_v56 = vmax.f32 %v928_v55, 0.0  ;;  %v1440_v57 = vpop.f32.mrb[12].mxu0 }
 0x22c   : > { %v1441_v58 = vpop.f32.mrb[13].mxu0 }
 0x22d   : > { %v1442_v59 = vadd.f32 %v1441_v58, %v1440_v57  ;;  %v1443_v60 = vpop.f32.mrb[14].mxu0  ;;  %v941_v61 = vpack.c.bf16 %v939_v56, %v938_v45 }
 0x22e   : > { %v1444_v62 = vpop.f32.mrb[15].mxu0 }
 0x22f   : > { %v933_v63 = vadd.f32 %v1442_v59, %v1386_v42  ;;  %1472 = vmatprep.mubr.bf16.mxu1 %v941_v61 }
 0x231   : > { %v940_v0 = vmax.f32 %v933_v63, 0.0 }
 0x233   : > { %v942_v1 = vpack.c.bf16 %v940_v0, %v940_v0 }
 0x235   : > { %1473 = vmatmul.mubr.bf16.vlgmr.msra.gmra.mrb[8].mxu1 %v942_v1 }
 0x256   : > { %v1129_v6 = vpop.permute.xlu1 %1128 }
 0x257   : > { %v1141_v8 = vsel %vm1877_vm4, %v1129_v6, -inf }
 0x258   : > { %v1145_v11 = vsel %vm1144_vm8, %v1141_v8, -inf }
 0x25a   : > { %v1134_v36 = vpop.permute.xlu0 %1133 }
 0x25b   : > { %v1142_v9 = vsel %vm1881_vm5, %v1134_v36, -inf }
 0x25c   : > { %v1146_v37 = vsel %vm1144_vm8, %v1142_v9, -inf }
 0x25d   : > { %v1148_v13 = vmax.f32 %v1145_v11, %v1146_v37 }
 0x25e   : > { %v1139_v12 = vpop.permute.xlu1 %1138 }
 0x25f   : > { %v1143_v14 = vsel %vm1890_vm9, %v1139_v12, -inf }
 0x260   : > { %v1147_v16 = vsel %vm1144_vm8, %v1143_v14, -inf }
 0x261   : > { %v1149_v18 = vmax.f32 %v1148_v13, %v1147_v16 }
 0x263   : > { %v1150_v20 = vrot.slane %v1149_v18, 4 }
 0x265   : > { %v1151_v21 = vmax.f32 %v1149_v18, %v1150_v20 }
 0x267   : > { %v1152_v22 = vrot.slane %v1151_v21, 2 }
 0x269   : > { %v1153_v23 = vmax.f32 %v1151_v21, %v1152_v22 }
 0x26b   : > { %v1154_v24 = vrot.slane %v1153_v23, 1 }
 0x26d   : > { %v1155_v28 = vmax.f32 %v1153_v23, %v1154_v24 }
 0x26f   : > { %v1157_v30 = vmul.f32 %v1904_v27, %v1155_v28  ;;  %v1156_v31 = vmul.f32 %v1900_v26, %v1155_v28  ;;  %v1158_v34 = vmul.f32 %v1908_v29, %v1155_v28 }
 0x271   : > { %v1162_v32 = vsel %vm1144_vm8, %v1157_v30, 0.0  ;;  %v1159_v33 = vsel %vm1144_vm8, %v1156_v31, 0.0  ;;  %v1165_v35 = vsel %vm1144_vm8, %v1158_v34, 0.0 }
 0x272   : > { %1163 = vadd.xlane.f32.xlu0 %v1162_v32  ;;  %1160 = vadd.xlane.f32.xlu1 %v1159_v33 }
 0x276   : > { %1166 = vadd.xlane.f32.xlu1 %v1165_v35 }
 0x2ff   : > { %v1164_v2 = vpop.xlane.xlu0 %1163  ;;  %v1161_v3 = vpop.xlane.xlu1 %1160 }
 0x300   : > { %v1168_v4 = vsub.f32 %v1857_v15, %v1161_v3  ;;  %v1169_v5 = vsub.f32 %v1860_v17, %v1164_v2 }
 0x302   : > { %v1171_v6 = vmul.f32 1.442695, %v1168_v4  ;;  %v1173_v8 = vmul.f32 1.442695, %v1169_v5 }
 0x303   : > { %v1167_v7 = vpop.xlane.xlu1 %1166 }
 0x304   : > { %v1170_v36 = vsub.f32 %v1863_v19, %v1167_v7  ;;  %1587 = vpow2.f32 %v1171_v6 }
 0x306   : > { %v1175_v9 = vmul.f32 1.442695, %v1170_v36 }
 0x308   : > { %1589 = vpow2.f32 %v1175_v9  ;;  %v1474_v41 = vpop.f32.mrb[8].mxu1 }
 0x309   : > { %1591 = vpow2.f32 %v1173_v8  ;;  %v1048_v43 = vpop.f32.mrb[9].mxu1 }
 0x30a   : > { %v1475_v44 = vpop.f32.mrb[10].mxu1 }
 0x30e   : > { %v1588_v37 = vpop.eup %1587 }
 0x30f   : > { %1179 = vperm.xlu1 %1511, %v1588_v37  }
 0x312   : > { %v1590_v10 = vpop.eup %1589 }
 0x313   : > { %v1592_v11 = vpop.eup %1591  ;;  %1189 = vperm.xlu0 %1512, %v1590_v10  }
 0x314   : > { %1184 = vperm.xlu1 %1511, %v1592_v11  }
 0x38e   : > { %v1180_v12 = vpop.permute.xlu1 %1179 }
 0x38f   : > { %v1192_v15 = vmul.f32 %v1900_v26, %v1180_v12 }
 0x391   : > { %v1195_v16 = vsel %vm1144_vm8, %v1192_v15, 0.0 }
 0x392   : > { %v1190_v13 = vpop.permute.xlu0 %1189 }
 0x393   : > { %v1185_v17 = vpop.permute.xlu1 %1184  ;;  %v1194_v14 = vmul.f32 %v1908_v29, %v1190_v13 }
 0x394   : > { %v1193_v19 = vmul.f32 %v1904_v27, %v1185_v17 }
 0x395   : > { %v1198_v21 = vsel %vm1144_vm8, %v1194_v14, 0.0 }
 0x396   : > { %v1196_v18 = vsel %vm1144_vm8, %v1193_v19, 0.0 }
 0x397   : > { %v1197_v20 = vadd.f32 %v1196_v18, %v1195_v16 }
 0x399   : > { %v1199_v22 = vadd.f32 %v1198_v21, %v1197_v20 }
 0x39b   : > { %v1200_v23 = vrot.slane %v1199_v22, 4 }
 0x39d   : > { %v1201_v24 = vadd.f32 %v1200_v23, %v1199_v22 }
 0x39f   : > { %v1202_v25 = vrot.slane %v1201_v24, 2 }
 0x3a1   : > { %v1203_v28 = vadd.f32 %v1202_v25, %v1201_v24 }
 0x3a3   : > { %v1204_v30 = vrot.slane %v1203_v28, 1 }
 0x3a5   : > { %v1205_v31 = vadd.f32 %v1204_v30, %v1203_v28 }
 0x3a7   : > { %v1207_v32 = vmul.f32 %v1904_v27, %v1205_v31  ;;  %v1206_v33 = vmul.f32 %v1900_v26, %v1205_v31  ;;  %v1208_v38 = vmul.f32 %v1908_v29, %v1205_v31  ;;  %v1403_v27 = vld [vmem:[%s1977_s6] ss:$0 sm:$0xff]  ;;  %v1051_v26 = vpop.f32.mrb[11].mxu1 }
 0x3a8   : > { %v1057_v46 = vadd.f32 %v1474_v41, %v1403_v27  ;;  %v1049_v47 = vadd.f32 %v1403_v27, %v1048_v43  ;;  %v1052_v48 = vadd.f32 %v1403_v27, %v1051_v26 }
 0x3a9   : > { %v1212_v34 = vsel %vm1144_vm8, %v1207_v32, 0.0  ;;  %v1209_v35 = vsel %vm1144_vm8, %v1206_v33, 0.0  ;;  %v1215_v40 = vsel %vm1144_vm8, %v1208_v38, 0.0 }
 0x3aa   : > { %1213 = vadd.xlane.f32.xlu0 %v1212_v34  ;;  %1210 = vadd.xlane.f32.xlu1 %v1209_v35  ;;  %1065 = vst.msk [vmem:[%s401_s26 + $0x10] sm:$0xff] %vm1062_vm10, %v1057_v46  ;;  %1063 = vst.msk [vmem:[%s401_s26] sm:$0xff] %vm1062_vm10, %v1049_v47 }
 0x3ab   : > { %1064 = vst.msk [vmem:[%s401_s26 + $0x8] sm:$0xff] %vm1062_vm10, %v1052_v48 }
 0x3ae   : > { %1216 = vadd.xlane.f32.xlu1 %v1215_v40 }
 0x437   : > { %v1214_v29 = vpop.xlane.xlu0 %1213  ;;  %v1211_v49 = vpop.xlane.xlu1 %1210 }
 0x438   : > { %1593 = vrcp.f32 %v1214_v29 }
 0x439   : > { %1595 = vrcp.f32 %v1211_v49 }
 0x43b   : > { %v1217_v42 = vpop.xlane.xlu1 %1216 }
 0x43c   : > { %1597 = vrcp.f32 %v1217_v42 }
 0x442   : > { %v1594_v50 = vpop.eup %1593 }
 0x443   : > { %v1596_v51 = vpop.eup %1595  ;;  %v1222_v52 = vmul.f32 %v1594_v50, %v1592_v11 }
 0x444   : > { %v1221_v53 = vmul.f32 %v1596_v51, %v1588_v37 }
 0x445   : > { %1226 = vst.msk [vmem:[%s407_s17 + $0x8] sm:$0xff] %vm1224_vm11, %v1222_v52 }
 0x446   : > { %v1598_v54 = vpop.eup %1597  ;;  %1225 = vst.msk [vmem:[%s407_s17] sm:$0xff] %vm1224_vm11, %v1221_v53 }
 0x447   : > { %v1223_v39 = vmul.f32 %v1598_v54, %v1590_v10 }
 0x449   : > { %1227 = vst.msk [vmem:[%s407_s17 + $0x10] sm:$0xff] %vm1224_vm11, %v1223_v39 }
 0x44a PF: > { %s25_s15 = sadd.s32 1, %s1669_s15  }
 0x44b   : > { %p22_p2 = scmp.ge.s32.totalorder %s25_s15, 4  }
 0x44d   :  { %24 = sbr.rel (!%p22_p2) target bundleno = 5 (0x5), region = 107 }
 0x454   :  { %1267 = vsyncpa [#allocation4], 1 }
 0x455   :  { %1269 = vsyncpa [#allocation4 + $0x1], 1 }
 0x456   :  { %1270 = vsyncpa [#allocation6], 1 }

</bundles_post_ra>
